<compile_context>
chip_gen: v6e
topology: v6e:2x2x1
jax: 0.10.0
libtpu: 0.0.40
codegen_flags: <defaults>
</compile_context>

<pallas_src>
import functools

import jax
import jax.numpy as jnp
import numpy as np
from jax.experimental import pallas as pl
from jax.experimental.pallas import tpu as pltpu

LEAKY_SLOPE = 0.1
BN_EPS = 1e-5


def _round_up(x, m):
    return (x + m - 1) // m * m


def _pair(v):
    return (v, v) if isinstance(v, int) else (int(v[0]), int(v[1]))


# ----------------------------- geometry helpers -------------------------------
def _axis_plan(size_in, k, s, p):
    """Per-axis sub-pixel plan for ConvTranspose (kernel k, stride s, padding p)."""
    assert 0 <= p <= k - 1, "padding must satisfy p <= k-1"
    size_out = (size_in - 1) * s - 2 * p + k
    if s > 1 and size_out % s == 0:
        s_eff, dilate = s, False          # true sub-pixel path on the raw input
    else:
        s_eff, dilate = 1, s > 1          # fallback: zero-dilated stride-1 conv
    size_e = (size_in - 1) * s + 1 if dilate else size_in
    d_min = -((k - 1 - p) // s_eff)
    d_max = (p + s_eff - 1) // s_eff
    win = d_max - d_min + 1
    q = size_out // s_eff
    pad_lo = -d_min
    pad_hi = max(0, q + d_max - size_e)
    return dict(size_out=size_out, s_eff=s_eff, dilate=dilate, d_min=d_min,
                win=win, q=q, pad_lo=pad_lo, pad_hi=pad_hi)


def _axis_taps(k, s_eff, p, d_min, win):
    """Kernel-tap index / validity for each (phase, window-offset) along one axis."""
    idx = np.zeros((s_eff, win), np.int32)
    val = np.zeros((s_eff, win), np.float32)
    for r in range(s_eff):
        for d in range(win):
            kk = r + p - s_eff * (d + d_min)
            if 0 <= kk < k:
                idx[r, d] = kk
                val[r, d] = 1.0
    return idx, val


def _phase_weight_matrix(w, taps_h, taps_w):
    """ConvTranspose2d weight (Cin, Cout, kh, kw) -> (P, Cout, Cin*win_h*win_w)."""
    idx_h, val_h = taps_h
    idx_w, val_w = taps_w
    g = w[:, :, idx_h, :]                      # (Cin, Cout, sh, win_h, kw)
    g = g[:, :, :, :, idx_w]                   # (Cin, Cout, sh, win_h, sw, win_w)
    mask = val_h[:, :, None, None] * val_w[None, None, :, :]
    g = g * jnp.asarray(mask, g.dtype)[None, None]
    g = jnp.transpose(g, (2, 4, 1, 0, 3, 5))   # (sh, sw, Cout, Cin, win_h, win_w)
    sh, sw, cout, cin, win_h, win_w = g.shape
    return g.reshape(sh * sw, cout, cin * win_h * win_w)


def _dilate(x, sh, sw):
    if sh == 1 and sw == 1:
        return x
    n, c, h, w = x.shape
    hd, wd = (h - 1) * sh + 1, (w - 1) * sw + 1
    return jnp.zeros((n, c, hd, wd), x.dtype).at[:, :, ::sh, ::sw].set(x)


def _window_im2col_t(xp, win_h, win_w, qh, qw):
    """Window im2col in transposed (K, M) layout, K order = (c, dh, dw)."""
    n, c, _, _ = xp.shape
    cols = []
    for dh in range(win_h):
        for dw in range(win_w):
            cols.append(xp[:, :, dh:dh + qh, dw:dw + qw])
    cols = jnp.stack(cols, axis=0)                     # (win, N, C, qh, qw)
    cols = jnp.transpose(cols, (2, 0, 1, 3, 4))        # (C, win, N, qh, qw)
    return cols.reshape(c * win_h * win_w, n * qh * qw)


# --------------------- Pass 1: fused complex GEMM + moments -------------------
def _gemm_stats_kernel(xr_ref, xi_ref, wl_ref, wrt_ref, a_ref, mom_ref):
    # [ar; ai] in one shot: two MXU matmuls, no post-GEMM slicing/concat.
    a = (jnp.dot(wl_ref[...], xr_ref[...], preferred_element_type=jnp.float32) +
         jnp.dot(wrt_ref[...], xi_ref[...], preferred_element_type=jnp.float32))
    a_ref[...] = a.astype(a_ref.dtype)                 # lane-dense store (2PC, TM)

    pc = a.shape[0] // 2
    mom = jnp.concatenate(
        [jnp.sum(a, axis=1, keepdims=True),            # sum(ar), sum(ai)
         jnp.sum(a * a, axis=1, keepdims=True),        # sum(ar^2), sum(ai^2)
         jnp.sum(a[:pc] * a[pc:], axis=1, keepdims=True)],  # sum(ar*ai)
        axis=0)                                        # (5*pc, 1) f32

    @pl.when(pl.program_id(1) == 0)
    def _init():
        mom_ref[...] = jnp.zeros_like(mom_ref)

    mom_ref[...] += mom[None, :, :]


def _pass1_gemm_stats(xrt, xit, w_left, w_right, tm, n_half, a_dtype):
    kdim, mp = xrt.shape
    rows = w_left.shape[0]
    mom_rows = 5 * (rows // 2)
    return pl.pallas_call(
        _gemm_stats_kernel,
        out_shape=(jax.ShapeDtypeStruct((rows, mp), a_dtype),
                   jax.ShapeDtypeStruct((2, mom_rows, 1), jnp.float32)),
        grid_spec=pltpu.PrefetchScalarGridSpec(
            num_scalar_prefetch=0,
            grid=(2, n_half),                          # (core-split, M tiles)
            in_specs=[pl.BlockSpec((kdim, tm), lambda c, i: (0, c * n_half + i)),
                      pl.BlockSpec((kdim, tm), lambda c, i: (0, c * n_half + i)),
                      pl.BlockSpec((rows, kdim), lambda c, i: (0, 0)),   # resident
                      pl.BlockSpec((rows, kdim), lambda c, i: (0, 0))],  # resident
            out_specs=(pl.BlockSpec((rows, tm), lambda c, i: (0, c * n_half + i)),
                       pl.BlockSpec((1, mom_rows, 1), lambda c, i: (c, 0, 0))),
        ),
        compiler_params=pltpu.CompilerParams(
            dimension_semantics=("parallel", "arbitrary")),
    )(xrt, xit, w_left, w_right)


# ------------------ Pass 2: whiten + affine + CLeakyReLU ----------------------
def _bn_act_kernel(leaky_slope, a_ref, coef_ref, y_ref):
    a = a_ref[...].astype(jnp.float32)                 # (2*pc, TM)
    pc = a.shape[0] // 2
    coef = coef_ref[...]                               # (2*pc, 3): [cA, cB, off]
    at, ab = a[:pc], a[pc:]
    y_top = coef[:pc, 0:1] * at + coef[:pc, 1:2] * ab + coef[:pc, 2:3]
    y_bot = coef[pc:, 0:1] * at + coef[pc:, 1:2] * ab + coef[pc:, 2:3]
    y = jnp.concatenate([y_top, y_bot], axis=0)
    y_ref[...] = jnp.where(y >= 0, y, leaky_slope * y)


def _pass2_bn_act(a, coef, leaky_slope, tm):
    rows, mp = a.shape
    return pl.pallas_call(
        functools.partial(_bn_act_kernel, leaky_slope),
        out_shape=jax.ShapeDtypeStruct((rows, mp), jnp.float32),
        grid_spec=pltpu.PrefetchScalarGridSpec(
            num_scalar_prefetch=0,
            grid=(mp // tm,),
            in_specs=[pl.BlockSpec((rows, tm), lambda i: (0, i)),
                      pl.BlockSpec(coef.shape, lambda i: (0, 0))],
            out_specs=pl.BlockSpec((rows, tm), lambda i: (0, i)),
        ),
        compiler_params=pltpu.CompilerParams(dimension_semantics=("parallel",)),
    )(a, coef)


# ------------------------------- BN solve (JAX) --------------------------------
def _bn_coefficients(mom, n_phase, cout, m_true, bn_params, eps):
    wrr, wri, wii, br, bi = bn_params
    pc = n_phase * cout
    mom = mom.sum(axis=0)[:, 0]                        # (5*pc,)
    s1 = mom[:2 * pc].reshape(2, n_phase, cout)
    s2 = mom[2 * pc:4 * pc].reshape(2, n_phase, cout)
    sx = mom[4 * pc:].reshape(n_phase, cout)
    inv_m = 1.0 / float(m_true)
    mr = s1[0].sum(0) * inv_m
    mi = s1[1].sum(0) * inv_m
    vrr = s2[0].sum(0) * inv_m - mr * mr + eps
    vii = s2[1].sum(0) * inv_m - mi * mi + eps
    vri = sx.sum(0) * inv_m - mr * mi
    tau = vrr + vii
    delta = jnp.maximum(vrr * vii - vri * vri, eps * eps)   # numerical guard
    sdet = jnp.sqrt(delta)
    t = jnp.sqrt(tau + 2.0 * sdet)
    rst = 1.0 / (sdet * t)
    urr = (sdet + vii) * rst
    uii = (sdet + vrr) * rst
    uri = -vri * rst
    zrr = wrr * urr + wri * uri
    zri = wrr * uri + wri * uii
    zir = wri * urr + wii * uri
    zii = wri * uri + wii * uii
    offr = br - zrr * mr - zri * mi                    # fold mean subtraction into bias
    offi = bi - zir * mr - zii * mi
    top = jnp.stack([zrr, zri, offr], axis=1)          # (C, 3)
    bot = jnp.stack([zir, zii, offi], axis=1)
    return jnp.concatenate([jnp.tile(top, (n_phase, 1)),
                            jnp.tile(bot, (n_phase, 1))], axis=0)   # (2*pc, 3)


# ------------------------------- JAX glue ------------------------------------
def pad2d_as(x1, x2):
    dh = x2.shape[2] - x1.shape[2]
    dw = x2.shape[3] - x1.shape[3]
    return jnp.pad(x1, ((0, 0), (0, 0), (0, dh), (0, dw)))


def padded_cat(x1, x2):
    return jnp.concatenate([pad2d_as(x1, x2), x2], axis=1)


def decoder_forward(params, xr, xi, skip=None, *,
                    compute_dtype=jnp.bfloat16, tile_m=8192):
    if skip is not None:
        xr = padded_cat(xr, skip[0])
        xi = padded_cat(xi, skip[1])
    # Cast before any padding / im2col so the HBM-materialized GEMM operands are
    # already in the (narrow) compute dtype.
    xr = xr.astype(compute_dtype)
    xi = xi.astype(compute_dtype)

    wr, wi = params["conv_wr"], params["conv_wi"]
    cin, cout, kh, kw = wr.shape
    sh, sw = _pair(params["stride"])
    ph, pw = _pair(params["padding"])

    n, _, hin, win_in = xr.shape
    plan_h = _axis_plan(hin, kh, sh, ph)
    plan_w = _axis_plan(win_in, kw, sw, pw)

    def im2col(x):
        xd = _dilate(x, sh if plan_h["dilate"] else 1, sw if plan_w["dilate"] else 1)
        xp = jnp.pad(xd, ((0, 0), (0, 0),
                          (plan_h["pad_lo"], plan_h["pad_hi"]),
                          (plan_w["pad_lo"], plan_w["pad_hi"])))
        return _window_im2col_t(xp, plan_h["win"], plan_w["win"],
                                plan_h["q"], plan_w["q"])

    xrt = im2col(xr)                                   # (K, M)
    xit = im2col(xi)

    taps_h = _axis_taps(kh, plan_h["s_eff"], ph, plan_h["d_min"], plan_h["win"])
    taps_w = _axis_taps(kw, plan_w["s_eff"], pw, plan_w["d_min"], plan_w["win"])
    wr_p = _phase_weight_matrix(wr, taps_h, taps_w)    # (P, Cout, K)
    wi_p = _phase_weight_matrix(wi, taps_h, taps_w)
    n_phase, _, kdim = wr_p.shape
    pc = n_phase * cout                                # rows per (real | imag) half
    w_left = jnp.concatenate([wr_p.reshape(pc, kdim),
                              wi_p.reshape(pc, kdim)], axis=0).astype(compute_dtype)
    w_right = jnp.concatenate([(-wi_p).reshape(pc, kdim),
                               wr_p.reshape(pc, kdim)], axis=0).astype(compute_dtype)

    # Pad K up to a multiple of 8 (zero rows -> no effect on the GEMM).
    kdim_p = _round_up(kdim, 8)
    if kdim_p != kdim:
        xrt = jnp.pad(xrt, ((0, kdim_p - kdim), (0, 0)))
        xit = jnp.pad(xit, ((0, kdim_p - kdim), (0, 0)))
        w_left = jnp.pad(w_left, ((0, 0), (0, kdim_p - kdim)))
        w_right = jnp.pad(w_right, ((0, 0), (0, kdim_p - kdim)))

    m = xrt.shape[1]
    tm = _round_up(min(tile_m, max(m, 128)), 128)
    n_split = 2                                        # grid split for v7x megacore
    mp = _round_up(m, tm * n_split)
    n_half = mp // (tm * n_split)
    pad_m = lambda x2d: jnp.pad(x2d, ((0, 0), (0, mp - m)))

    # Zero-padded M columns contribute exactly zero to every moment sum, so the
    # statistics (divided by the true element count) stay correct.
    a, mom = _pass1_gemm_stats(pad_m(xrt), pad_m(xit), w_left, w_right,
                               tm, n_half, compute_dtype)

    m_true = n * plan_h["size_out"] * plan_w["size_out"]
    bn = tuple(params[name] for name in ("bn_wrr", "bn_wri", "bn_wii", "bn_br", "bn_bi"))
    coef = _bn_coefficients(mom, n_phase, cout, m_true, bn, BN_EPS)

    y = _pass2_bn_act(a, coef, float(params["leaky_slope"]), tm)   # (2*pc, mp) f32

    y = y[:, :m].reshape(2, plan_h["s_eff"], plan_w["s_eff"], cout,
                         n, plan_h["q"], plan_w["q"])
    y = jnp.transpose(y, (0, 4, 3, 5, 1, 6, 2))
    y = y.reshape(2, n, cout, plan_h["size_out"], plan_w["size_out"])
    return y[0], y[1]


# ----------------------- Pure-JAX reference (check) ---------------------------
def _conv_transpose_ref(x, w, stride, padding):
    kh, kw = w.shape[2], w.shape[3]
    sh, sw = _pair(stride)
    ph, pw = _pair(padding)
    w_oihw = jnp.transpose(w[:, :, ::-1, ::-1], (1, 0, 2, 3))
    return jax.lax.conv_general_dilated(
        x, w_oihw, window_strides=(1, 1),
        padding=[(kh - 1 - ph, kh - 1 - ph), (kw - 1 - pw, kw - 1 - pw)],
        lhs_dilation=(sh, sw),
        dimension_numbers=("NCHW", "OIHW", "NCHW"))


def decoder_reference(params, xr, xi, skip=None):
    if skip is not None:
        xr = padded_cat(xr, skip[0])
        xi = padded_cat(xi, skip[1])
    wr, wi = params["conv_wr"], params["conv_wi"]
    s, p = params["stride"], params["padding"]
    ar = _conv_transpose_ref(xr, wr, s, p) - _conv_transpose_ref(xi, wi, s, p)
    ai = _conv_transpose_ref(xi, wr, s, p) + _conv_transpose_ref(xr, wi, s, p)
    axes = (0, 2, 3)
    mr, mi = ar.mean(axes, keepdims=True), ai.mean(axes, keepdims=True)
    cr, ci = ar - mr, ai - mi
    vrr = (cr * cr).mean(axes, keepdims=True) + BN_EPS
    vri = (cr * ci).mean(axes, keepdims=True)
    vii = (ci * ci).mean(axes, keepdims=True) + BN_EPS
    tau, delta = vrr + vii, vrr * vii - vri * vri
    sdet = jnp.sqrt(delta)
    t = jnp.sqrt(tau + 2.0 * sdet)
    rst = 1.0 / (sdet * t)
    urr, uii, uri = (sdet + vii) * rst, (sdet + vrr) * rst, -vri * rst
    v = lambda name: params[name].reshape(1, -1, 1, 1)
    wrr_, wri_, wii_ = v("bn_wrr"), v("bn_wri"), v("bn_wii")
    zrr = wrr_ * urr + wri_ * uri
    zri = wrr_ * uri + wri_ * uii
    zir = wri_ * urr + wii_ * uri
    zii = wri_ * uri + wii_ * uii
    yr = zrr * cr + zri * ci + v("bn_br")
    yi = zir * cr + zii * ci + v("bn_bi")
    ls = params["leaky_slope"]
    return (jnp.where(yr >= 0, yr, ls * yr), jnp.where(yi >= 0, yi, ls * yi))


# --------------------------------- main ---------------------------------------
if __name__ == "__main__":
    key = jax.random.PRNGKey(0)
    ks = jax.random.split(key, 10)

    # ---- Config A: dconv_cfg = (in=8, out=4, kernel=4, stride=2, padding=1) ----
    cin_dec, cin_skip, cout, ksz, stride, padding = 4, 4, 4, 4, 2, 1
    params = {
        "conv_wr": 0.1 * jax.random.normal(ks[0], (cin_dec + cin_skip, cout, ksz, ksz), jnp.float32),
        "conv_wi": 0.1 * jax.random.normal(ks[1], (cin_dec + cin_skip, cout, ksz, ksz), jnp.float32),
        "bn_wrr": jnp.ones((cout,), jnp.float32),
        "bn_wri": jnp.full((cout,), 0.1, jnp.float32),
        "bn_wii": jnp.ones((cout,), jnp.float32),
        "bn_br": jnp.full((cout,), 0.05, jnp.float32),
        "bn_bi": jnp.full((cout,), -0.05, jnp.float32),
        "stride": stride,
        "padding": padding,
        "leaky_slope": LEAKY_SLOPE,
    }
    # Decoder input slightly smaller than skip so padded_cat actually pads.
    xr = jax.random.normal(ks[2], (2, cin_dec, 15, 15), jnp.float32)
    xi = jax.random.normal(ks[3], (2, cin_dec, 15, 15), jnp.float32)
    skip = (jax.random.normal(ks[4], (2, cin_skip, 16, 16), jnp.float32),
            jax.random.normal(ks[5], (2, cin_skip, 16, 16), jnp.float32))

    yr_ref, yi_ref = decoder_reference(params, xr, xi, skip)

    # 1) f32 path with a tile that does NOT divide M (exercises the padded M tail
    #    and the 2-way core split).
    yr32, yi32 = decoder_forward(params, xr, xi, skip=skip,
                                 compute_dtype=jnp.float32, tile_m=384)
    jax.block_until_ready((yr32, yi32))
    np.testing.assert_allclose(np.asarray(yr32), np.asarray(yr_ref), atol=2e-2, rtol=2e-2)
    np.testing.assert_allclose(np.asarray(yi32), np.asarray(yi_ref), atol=2e-2, rtol=2e-2)

    # 2) Default bf16 MXU path (f32 accumulation / f32 BN statistics).
    yrb, yib = decoder_forward(params, xr, xi, skip=skip)
    jax.block_until_ready((yrb, yib))
    np.testing.assert_allclose(np.asarray(yrb), np.asarray(yr_ref), atol=5e-2, rtol=5e-2)
    np.testing.assert_allclose(np.asarray(yib), np.asarray(yi_ref), atol=5e-2, rtol=5e-2)

    # ---- Config B: kernel=3, stride=2, padding=1 (odd output) -> dilated fallback,
    #      no skip connection. ----
    paramsB = {
        "conv_wr": 0.1 * jax.random.normal(ks[6], (cin_dec, cout, 3, 3), jnp.float32),
        "conv_wi": 0.1 * jax.random.normal(ks[7], (cin_dec, cout, 3, 3), jnp.float32),
        "bn_wrr": jnp.ones((cout,), jnp.float32),
        "bn_wri": jnp.full((cout,), -0.2, jnp.float32),
        "bn_wii": jnp.ones((cout,), jnp.float32),
        "bn_br": jnp.full((cout,), 0.1, jnp.float32),
        "bn_bi": jnp.full((cout,), 0.02, jnp.float32),
        "stride": 2,
        "padding": 1,
        "leaky_slope": LEAKY_SLOPE,
    }
    xbr = jax.random.normal(ks[8], (2, cin_dec, 16, 16), jnp.float32)
    xbi = jax.random.normal(ks[9], (2, cin_dec, 16, 16), jnp.float32)
    yrB_ref, yiB_ref = decoder_reference(paramsB, xbr, xbi, None)
    yrB, yiB = decoder_forward(paramsB, xbr, xbi, skip=None, compute_dtype=jnp.float32)
    jax.block_until_ready((yrB, yiB))
    np.testing.assert_allclose(np.asarray(yrB), np.asarray(yrB_ref), atol=2e-2, rtol=2e-2)
    np.testing.assert_allclose(np.asarray(yiB), np.asarray(yiB_ref), atol=2e-2, rtol=2e-2)

    print("KERNEL_OK")
</pallas_src>

<mosaic_0001>
module attributes {stable_mosaic.version = 11 : i64} {
  func.func @_gemm_stats_kernel(%arg0: i32, %arg1: i32, %arg2: memref<72x384xf32, #tpu.memory_space<vmem>>, %arg3: memref<72x384xf32, #tpu.memory_space<vmem>>, %arg4: memref<32x72xf32, #tpu.memory_space<vmem>>, %arg5: memref<32x72xf32, #tpu.memory_space<vmem>>, %arg6: memref<32x384xf32, #tpu.memory_space<vmem>>, %arg7: memref<1x80x1xf32, #tpu.memory_space<vmem>>) attributes {dimension_semantics = [#tpu.dimension_semantics<parallel>, #tpu.dimension_semantics<arbitrary>], iteration_bounds = array<i64: 2, 1>, scalar_prefetch = 0 : i64, scratch_operands = 0 : i64, tpu.core_type = #tpu.core_type<tc>, window_params = [{transform_indices = @transform_0, window_bounds = array<i64: 72, 384>}, {transform_indices = @transform_1, window_bounds = array<i64: 72, 384>}, {pipeline_mode = #tpu.pipeline_mode<synchronous>, transform_indices = @transform_2, window_bounds = array<i64: 32, 72>}, {pipeline_mode = #tpu.pipeline_mode<synchronous>, transform_indices = @transform_3, window_bounds = array<i64: 32, 72>}, {transform_indices = @transform_4, window_bounds = array<i64: 32, 384>}, {transform_indices = @transform_5, window_bounds = array<i64: 1, 80, 1>}]} {
    %c0 = arith.constant 0 : index
    %c0_0 = arith.constant 0 : index
    %0 = vector.load %arg4[%c0, %c0_0] : memref<32x72xf32, #tpu.memory_space<vmem>>, vector<32x72xf32>
    %c0_1 = arith.constant 0 : index
    %c0_2 = arith.constant 0 : index
    %1 = vector.load %arg2[%c0_1, %c0_2] : memref<72x384xf32, #tpu.memory_space<vmem>>, vector<72x384xf32>
    %cst = arith.constant dense<0.000000e+00> : vector<32x384xf32>
    %2 = tpu.matmul %0, %1, %cst {dimension_numbers = #tpu.dot_dimension_numbers<[1], [0], [0], [1], [0, 0, 1, 1], [], []>} : vector<32x72xf32>, vector<72x384xf32>, vector<32x384xf32> -> vector<32x384xf32>
    %c0_3 = arith.constant 0 : index
    %c0_4 = arith.constant 0 : index
    %3 = vector.load %arg5[%c0_3, %c0_4] : memref<32x72xf32, #tpu.memory_space<vmem>>, vector<32x72xf32>
    %c0_5 = arith.constant 0 : index
    %c0_6 = arith.constant 0 : index
    %4 = vector.load %arg3[%c0_5, %c0_6] : memref<72x384xf32, #tpu.memory_space<vmem>>, vector<72x384xf32>
    %cst_7 = arith.constant dense<0.000000e+00> : vector<32x384xf32>
    %5 = tpu.matmul %3, %4, %cst_7 {dimension_numbers = #tpu.dot_dimension_numbers<[1], [0], [0], [1], [0, 0, 1, 1], [], []>} : vector<32x72xf32>, vector<72x384xf32>, vector<32x384xf32> -> vector<32x384xf32>
    %6 = arith.addf %2, %5 : vector<32x384xf32>
    %c0_8 = arith.constant 0 : index
    %c0_9 = arith.constant 0 : index
    %7 = vector.load %arg6[%c0_8, %c0_9] : memref<32x384xf32, #tpu.memory_space<vmem>>, vector<32x384xf32>
    tpu.vector_store %arg6[%c0_8, %c0_9], %6 {strides = array<i32>} : memref<32x384xf32, #tpu.memory_space<vmem>>, vector<32x384xf32>,
    %cst_10 = arith.constant dense<0.000000e+00> : vector<32xf32>
    %8 = vector.multi_reduction <add>, %6, %cst_10 [1] : vector<32x384xf32> to vector<32xf32>
    %9 = vector.shape_cast %8 : vector<32xf32> to vector<32x1xf32>
    %10 = arith.mulf %6, %6 : vector<32x384xf32>
    %cst_11 = arith.constant dense<0.000000e+00> : vector<32xf32>
    %11 = vector.multi_reduction <add>, %10, %cst_11 [1] : vector<32x384xf32> to vector<32xf32>
    %12 = vector.shape_cast %11 : vector<32xf32> to vector<32x1xf32>
    %13 = vector.extract_strided_slice %6 {offsets = [0, 0], sizes = [16, 384], strides = [1, 1]} : vector<32x384xf32> to vector<16x384xf32>
    %14 = vector.extract_strided_slice %6 {offsets = [16, 0], sizes = [16, 384], strides = [1, 1]} : vector<32x384xf32> to vector<16x384xf32>
    %15 = arith.mulf %13, %14 : vector<16x384xf32>
    %cst_12 = arith.constant dense<0.000000e+00> : vector<16xf32>
    %16 = vector.multi_reduction <add>, %15, %cst_12 [1] : vector<16x384xf32> to vector<16xf32>
    %17 = vector.shape_cast %16 : vector<16xf32> to vector<16x1xf32>
    %18 = tpu.concatenate %9, %12, %17 in 0 : vector<32x1xf32>, vector<32x1xf32>, vector<16x1xf32> -> vector<80x1xf32>
    %c0_i32 = arith.constant 0 : i32
    %19 = arith.cmpi eq, %arg1, %c0_i32 : i32
    %20 = arith.extui %19 : i1 to i32
    %c0_i32_13 = arith.constant 0 : i32
    %21 = arith.cmpi ne, %20, %c0_i32_13 : i32
    scf.if %21 {
      %cst_20 = arith.constant 0.000000e+00 : f32
      %26 = vector.broadcast %cst_20 : f32 to vector<1x80x1xf32>
      %c0_21 = arith.constant 0 : index
      %c0_22 = arith.constant 0 : index
      %c0_23 = arith.constant 0 : index
      %27 = vector.load %arg7[%c0_21, %c0_22, %c0_23] : memref<1x80x1xf32, #tpu.memory_space<vmem>>, vector<1x80x1xf32>
      tpu.vector_store %arg7[%c0_21, %c0_22, %c0_23], %26 {strides = array<i32>} : memref<1x80x1xf32, #tpu.memory_space<vmem>>, vector<1x80x1xf32>,
    } else {
    }
    %c0_14 = arith.constant 0 : index
    %c0_15 = arith.constant 0 : index
    %c0_16 = arith.constant 0 : index
    %22 = vector.load %arg7[%c0_14, %c0_15, %c0_16] : memref<1x80x1xf32, #tpu.memory_space<vmem>>, vector<1x80x1xf32>
    %23 = vector.shape_cast %18 : vector<80x1xf32> to vector<1x80x1xf32>
    %24 = arith.addf %22, %23 : vector<1x80x1xf32>
    %c0_17 = arith.constant 0 : index
    %c0_18 = arith.constant 0 : index
    %c0_19 = arith.constant 0 : index
    %25 = vector.load %arg7[%c0_17, %c0_18, %c0_19] : memref<1x80x1xf32, #tpu.memory_space<vmem>>, vector<1x80x1xf32>
    tpu.vector_store %arg7[%c0_17, %c0_18, %c0_19], %24 {strides = array<i32>} : memref<1x80x1xf32, #tpu.memory_space<vmem>>, vector<1x80x1xf32>,
    return
  }
  func.func @transform_0(%arg0: i32, %arg1: i32) -> (i32, i32) {
    %c1_i32 = arith.constant 1 : i32
    %0 = arith.muli %arg0, %c1_i32 : i32
    %1 = arith.addi %0, %arg1 : i32
    %c0_i32 = arith.constant 0 : i32
    %c0_i32_0 = arith.constant 0 : i32
    return %c0_i32, %1 : i32, i32
  }
  func.func @transform_1(%arg0: i32, %arg1: i32) -> (i32, i32) {
    %c1_i32 = arith.constant 1 : i32
    %0 = arith.muli %arg0, %c1_i32 : i32
    %1 = arith.addi %0, %arg1 : i32
    %c0_i32 = arith.constant 0 : i32
    %c0_i32_0 = arith.constant 0 : i32
    return %c0_i32, %1 : i32, i32
  }
  func.func @transform_2(%arg0: i32, %arg1: i32) -> (i32, i32) {
    %c0_i32 = arith.constant 0 : i32
    %c0_i32_0 = arith.constant 0 : i32
    %c0_i32_1 = arith.constant 0 : i32
    return %c0_i32, %c0_i32_0 : i32, i32
  }
  func.func @transform_3(%arg0: i32, %arg1: i32) -> (i32, i32) {
    %c0_i32 = arith.constant 0 : i32
    %c0_i32_0 = arith.constant 0 : i32
    %c0_i32_1 = arith.constant 0 : i32
    return %c0_i32, %c0_i32_0 : i32, i32
  }
  func.func @transform_4(%arg0: i32, %arg1: i32) -> (i32, i32) {
    %c1_i32 = arith.constant 1 : i32
    %0 = arith.muli %arg0, %c1_i32 : i32
    %1 = arith.addi %0, %arg1 : i32
    %c0_i32 = arith.constant 0 : i32
    %c0_i32_0 = arith.constant 0 : i32
    return %c0_i32, %1 : i32, i32
  }
  func.func @transform_5(%arg0: i32, %arg1: i32) -> (i32, i32, i32) {
    %c0_i32 = arith.constant 0 : i32
    %c0_i32_0 = arith.constant 0 : i32
    %c0_i32_1 = arith.constant 0 : i32
    return %arg0, %c0_i32, %c0_i32_0 : i32, i32, i32
  }
}

</mosaic_0001>

<bundles_post_ra>
// kernel: tpu_custom_call.1
= control target key start
LH: loop header
LB: loop body
LE: loop exit
PB: predicated region body
PF: predicated region fallthrough
CT: control target
= control target key end

     0   :  { %s1935_s0 = inlined_call_operand.hbm [shape: f32[72,768], index: 0, kind: input, shape index: {}]   ;;  %s1936_s1 = inlined_call_operand.hbm [shape: f32[72,768], index: 1, kind: input, shape index: {}]   ;;  %s1937_s2 = inlined_call_operand.hbm [shape: f32[32,72], index: 2, kind: input, shape index: {}]   ;;  %s1938_s3 = inlined_call_operand.hbm [shape: f32[32,72], index: 3, kind: input, shape index: {}]   ;;  %s1939_s4 = inlined_call_operand.hbm [shape: f32[32,768], index: 4, kind: output, shape index: {0}]   ;;  %s1940_s5 = inlined_call_operand.vmem [shape: f32[2,80,1], index: 5, kind: output, shape index: {1}]  }
   0x1   :  { %1947 = sst [smem:[#allocation20_spill]] %s1935_s0 }
   0x2   :  { %1948 = sst [smem:[#allocation21_spill]] %s1937_s2 }
   0x3   :  { %1949 = sst [smem:[#allocation22_spill]] %s1938_s3 }
   0x4   :  { %11 = vsyncpa [#allocation3], 0 }
   0x5   :  { %13 = vsyncpa [#allocation3 + $0x1], 0 }
   0x6   :  { %14 = vsyncpa [#allocation6], 0 }
   0x7   :  { %16 = vsyncpa [#allocation6 + $0x1], 0 }
   0x8   :  { %17 = vsyncpa [#allocation9], 0 }
   0x9   :  { %18 = vsyncpa [#allocation4], 0 }
   0xa   :  { %20 = vsyncpa [#allocation4 + $0x1], 0  ;;  %s1532_s18 = smov 0   ;;  %s1534_s19 = smov 0  }
   0xb   :  { %s1536_s20 = smov 0   ;;  %s1538_s21 = smov 0  }
   0xc   :  { %s1540_s22 = smov 0   ;;  %s1542_s23 = smov 0  }
   0xd LB: > { %1950 = sst [smem:[#allocation16_spill]] %s1474_s20  ;;  %s1563_s24 = sadd.s32 4294967295, %s1486_s23   ;;  %s1486_s23 = sphi %s1542_s23, %s26_s23   ;;  %s1482_s22 = sphi %s1540_s22, %s1979_s22   ;;  %s1478_s21 = sphi %s1538_s21, %s1978_s21   ;;  %s1474_s20 = sphi %s1536_s20, %s1974_s20   ;;  %s1470_s19 = sphi %s1534_s19, %s1977_s19   ;;  %s1466_s18 = sphi %s1532_s18, %s1976_s18  }
   0xe   : > { %s1077_s25 = sadd.s32 4294967294, %s1486_s23   ;;  %s47_s26 = sadd.s32 1, %s1474_s20 }
   0xf   : > { %p54_p0 = scmp.ne.s32.totalorder %s1474_s20, %s1470_s19  ;;  %p55_p1 = scmp.eq.s32.totalorder %s1486_s23, 0 }
  0x10   : > { %p60_p2 = scmp.ne.s32.totalorder %s1470_s19, %s1466_s18  ;;  %p1941_p3 = scmp.eq.s32.totalorder %s1563_s24, 0 }
  0x11   : > { %p156_p4 = scmp.eq.s32.totalorder %s1563_s24, 1  ;;  %p1574_p5 = por %p55_p1, %p54_p0 }
  0x12   : > { %p162_p6 = scmp.eq.s32.totalorder %s1077_s25, 1  ;;  %p1580_p7 = por %p1941_p3, %p60_p2 }
  0x13   : > { %p1584_p8 = por %p156_p4, %p54_p0  ;;  %p1078_p10 = scmp.ge.s32.totalorder %s1486_s23, 1 }
  0x14   : > { %s1952_s28 = scalar_select %p1580_p7, 1, 0 }
  0x15   : > { %s1953_s29 = scalar_select %p1584_p8, 1, 0 }
  0x16   : > { %p1588_p9 = por %p162_p6, %p60_p2  ;;  %p195_p11 = scmp.lt.s32.totalorder %s1486_s23, 3 }
  0x17   : > { %s1488_s7 = smov [#allocation7]   ;;  %p1223_p1 = scmp.lt.s32.totalorder %s1486_s23, 2 }
  0x18   : > { %s1954_s30 = scalar_select %p1588_p9, 1, 0 }
  0x19   : > { %p1594_p12 = pnand %p1078_p10, %p195_p11  ;;  %s207_s8 = sshll.u32 %s1488_s7, 4  ;;  %s208_s8 = int_to_ptr.vmem [resolvable:$true] %s207_s8 }
  0x1a   : > { %1955 = sst [smem:[#allocation17_spill]] %s1954_s30  ;;  %s1489_s10 = smov [#allocation8]  }
  0x1b   : > { %p1203_p13 = pneg %p1594_p12  ;;  %s220_s11 = sshll.u32 %s1489_s10, 4  ;;  %s221_s11 = int_to_ptr.vmem [resolvable:$true] %s220_s11 }
  0x1c   : > { %p1610_p2 = pnand %p1223_p1, %p1574_p5  ;;  %s1297_s13 = scalar_lea.vmem %s208_s8, 512 }
  0x1d   : > { %p1604_p4 = pnand %p1203_p13, %p1941_p3  ;;  %p1298_p10 = scmp.ne.s32.totalorder %s208_s8, %s1297_s13 }
  0x1e   : > { %p1305_p0 = scmp.lt.s32.totalorder %s208_s8, %s208_s8  ;;  %p1306_p3 = scmp.lt.s32.totalorder %s1297_s13, %s1297_s13 }
  0x1f   : > { %p1288_p6 = pneg %p1604_p4 }
  0x20   : > { %p1307_p9 = por %p1306_p3, %p1305_p0 }
  0x21   : > { %p1300_p11 = pnand %p1298_p10, %p1288_p6 }
  0x23   : > { %p1301_p13 = pneg %p1300_p11 }
  0x25   : > { %p1308_p8 = pnand %p1307_p9, %p1301_p13 }
  0x27   : > { %1311 = shalt.err (!%p1308_p8)
}
  0x28   : > { %s1490_s14 = smov 128   ;;  %s1491_s15 = smov 8  }
  0x29   : > { %s1959_s2 = sld [smem:[#allocation21_spill]]  ;;  %s1323_s25 = scalar_lea.vmem %s221_s11, 512 }
  0x2a   : > { %p1324_p5 = scmp.ne.s32.totalorder %s221_s11, %s1323_s25  ;;  %p1331_p11 = scmp.lt.s32.totalorder %s221_s11, %s221_s11 }
  0x2b   : > { %p1332_p7 = scmp.lt.s32.totalorder %s1323_s25, %s1323_s25 }
  0x2c   : > { %p1326_p1 = pnand %p1324_p5, %p1288_p6 }
  0x2d   : > { %p1333_p3 = por %p1332_p7, %p1331_p11 }
  0x2e   : > { %p1327_p10 = pneg %p1326_p1 }
  0x2f   : > { %1206 = dma.hbm_to_vmem [thread:$0]  (!%p1604_p4), %s1959_s2, 512, %s208_s8, [#allocation6], %s1490_s14, %s1490_s14, %s1491_s15  }
  0x30   : > { %p1334_p9 = pnand %p1333_p3, %p1327_p10 }
  0x32   : > { %1337 = shalt.err (!%p1334_p9)
}
  0x33   : > { %s1960_s3 = sld [smem:[#allocation22_spill]]  ;;  %s38_s8 = sadd.s32 1, %s1482_s22 }
  0x34   : > { %s234_s10 = sand.u32 1, %s1474_s20   ;;  %p40_p7 = scmp.ge.s32.totalorder %s38_s8, 2 }
  0x35   : > { %s1634_s13 = smul.u32 216, %s234_s10  ;;  %s1962_s0 = sld [smem:[#allocation20_spill]] }
  0x36   : > { %s1981_s8 = smov (%p40_p7, %s38_s8), 0  ;;  %s1107_s9 = smul.u32 384, %s1482_s22 }
  0x37   : > { %1961 = sst [smem:[#allocation18_spill]] %s1981_s8  ;;  %s44_s16 = ssub.s32 %s1482_s22, %s1981_s8 }
  0x38   : > { %s238_s17 = scalar_lea.vmem [#allocation2], %s1634_s13  ;;  %p45_p8 = scmp.eq.s32.totalorder %s44_s16, 0 }
  0x39   : > { %1209 = dma.hbm_to_vmem [thread:$0]  (!%p1604_p4), %s1960_s3, 512, %s221_s11, [#allocation9], %s1490_s14, %s1490_s14, %s1491_s15  }
  0x3a   : > { %s246_s25 = sshll.u32 %s238_s17, 4  ;;  %s235_s15 = scalar_lea.sflag [#allocation3], %s234_s10  ;;  %s247_s25 = int_to_ptr.vmem [resolvable:$true] %s246_s25 }
  0x3b   : > { %s245_s11 = scalar_lea.hbm %s1962_s0, %s1107_s9  ;;  %p1340_p0 = pneg %p1610_p2 }
  0x3c   : > { %s1650_s14 = scalar_select %p45_p8, %s1474_s20, %s47_s26  }
  0x3d   : > { %s1351_s2 = scalar_lea.vmem %s247_s25, 3456  ;;  %s1492_s17 = smov [#allocation2]  }
  0x3e   : > { %1963 = sst [smem:[#allocation19_spill]] %s1650_s14  ;;  %p1352_p4 = scmp.ne.s32.totalorder %s247_s25, %s1351_s2 }
  0x3f   : > { %s1356_s16 = sshll.u32 %s1492_s17, 4  ;;  %s1357_s16 = int_to_ptr.vmem [resolvable:$false] %s1356_s16 }
  0x40   : > { %p1354_p6 = pnand %p1352_p4, %p1340_p0  ;;  %s1358_s3 = scalar_lea.vmem %s1357_s16, 6912 }
  0x41   : > { %p1359_p5 = scmp.lt.s32.totalorder %s247_s25, %s1357_s16  ;;  %p1360_p1 = scmp.lt.s32.totalorder %s1358_s3, %s1351_s2 }
  0x42   : > { %p1355_p13 = pneg %p1354_p6 }
  0x43   : > { %p1361_p10 = por %p1360_p1, %p1359_p5 }
  0x45   : > { %p1362_p11 = pnand %p1361_p10, %p1355_p13 }
  0x47   : > { %1365 = shalt.err (!%p1362_p11)
}
  0x48   : > { %s1493_s26 = smov 768   ;;  %s1494_s10 = smov 384  }
  0x49   : > { %s1495_s27 = smov 24   ;;  %s256_s7 = sand.u32 1, %s1486_s23  }
  0x4a   : > { %1213 = dma.hbm_to_vmem [thread:$0]  (!%p1610_p2), %s245_s11, 3456, %s247_s25, %s235_s15, %s1493_s26, %s1494_s10, %s1495_s27  }
  0x4b   : > { %s267_s16 = scalar_lea.hbm %s1936_s1, %s1107_s9  ;;  %s260_s2 = scalar_lea.vmem [#allocation5], %s1634_s13 }
  0x4c   : > { %s268_s3 = sshll.u32 %s260_s2, 4  ;;  %s257_s8 = scalar_lea.sflag [#allocation6], %s256_s7  ;;  %s269_s3 = int_to_ptr.vmem [resolvable:$true] %s268_s3 }
  0x4d   : > { %s1379_s14 = scalar_lea.vmem %s269_s3, 3456  ;;  %s1496_s20 = smov [#allocation5]  }
  0x4e   : > { %p1380_p3 = scmp.ne.s32.totalorder %s269_s3, %s1379_s14  ;;  %s1384_s30 = sshll.u32 %s1496_s20, 4  ;;  %s1385_s30 = int_to_ptr.vmem [resolvable:$false] %s1384_s30 }
  0x4f   : > { %s1386_s25 = scalar_lea.vmem %s1385_s30, 6912  ;;  %p1387_p8 = scmp.lt.s32.totalorder %s269_s3, %s1385_s30 }
  0x50   : > { %p1382_p9 = pnand %p1380_p3, %p1340_p0  ;;  %p1388_p4 = scmp.lt.s32.totalorder %s1386_s25, %s1379_s14 }
  0x52   : > { %p1383_p7 = pneg %p1382_p9  ;;  %p1389_p6 = por %p1388_p4, %p1387_p8 }
  0x54   : > { %p1390_p13 = pnand %p1389_p6, %p1383_p7 }
  0x56   : > { %1393 = shalt.err (!%p1390_p13)
}
  0x57   : > { %1216 = dma.hbm_to_vmem [thread:$0]  (!%p1610_p2), %s267_s16, 3456, %s269_s3, %s257_s8, %s1493_s26, %s1494_s10, %s1495_s27  }
  0x58   : > { %280 = sbr.rel (%p1594_p12) target bundleno = 512 (0x200), region = 36  ;;  %s1674_s0 = sand.u32 (!%p1594_p12), 1, %s1470_s19  }
  0x59   : > { %s1186_s20 = smul.u32 (!%p1594_p12), 216, %s1674_s0  ;;  %s283_s13 = scalar_lea.sflag (!%p1594_p12), [#allocation3], %s1674_s0 }
  0x5a   : > { %p1964_p0 = scmp.ne.s32.totalorder (!%p1594_p12), %s1952_s28, 0 }
  0x5b   : > { %s1678_s9 = scalar_lea.vmem (!%p1594_p12), [#allocation2], %s1186_s20 }
  0x5d   : > { %1445 = dma.done.wait (%p1964_p0), %s283_s13, 3456  }
  0x5e   : > { %1447 = vsyncadd (%p1964_p0), %s283_s13, 4294963840  ;;  %s291_s30 = sand.u32 1, %s1563_s24   ;;  %s1685_s12 = scalar_lea.vmem [#allocation5], %s1186_s20 }
  0x5f   : > { %s292_s6 = scalar_lea.sflag [#allocation6], %s291_s30 }
  0x60   : > { %1449 = dma.done.wait (%p1964_p0), %s292_s6, 3456  }
  0x61   : > { %1451 = vsyncadd (%p1964_p0), %s292_s6, 4294963840  ;;  %p1965_p12 = scmp.eq.s32.totalorder %s1563_s24, 0 }
  0x63   : > { %1453 = dma.done.wait (%p1965_p12), [#allocation6], 512   ;;  %p1966_p2 = pmov %p1965_p12 }
  0x65   : > { %1455 = vsyncadd (%p1966_p2), [#allocation6], 4294966784  ;;  %p1967_p5 = pmov %p1966_p2 }
  0x66   : > { %p1968_p1 = pmov %p1966_p2 }
  0x67   : > { %1457 = dma.done.wait (%p1967_p5), [#allocation9], 512  }
  0x68   : > { %1459 = vsyncadd (%p1968_p1), [#allocation9], 4294966784  ;;  %v1497_v0 = vmov 0.0   ;;  %v411_v1 = vld [vmem:[%s1685_s12 + $0xc8] sm:$0xff]  ;;  %v412_v2 = vld [vmem:[%s1685_s12 + $0xd0] sm:$0xff]  ;;  %vm413_vm0 = vcmask 588800  }
  0x69   : > { %490 = vmatprep.mubr.f32.mxu0 %v1497_v0  ;;  %v410_v3 = vld [vmem:[%s1685_s12 + $0xc0] sm:$0xff]  ;;  %440 = vmatprep.subr.mxu0 %v411_v1  ;;  %v408_v4 = vld [vmem:[%s1685_s12 + $0xb0] sm:$0xff]  ;;  %v409_v5 = vld [vmem:[%s1685_s12 + $0xb8] sm:$0xff]  ;;  %p346_p10 = scmp.lt.s32.totalorder %s1478_s21, 1  ;;  %vm860_vm1 = vcmask 7168   ;;  %s1187_s15 = smul.u32 96, %s1674_s0 }
  0x6a   : > { %1136 = vmatprep.subr.mxu1 %v412_v2  ;;  %v407_v6 = vld [vmem:[%s1685_s12 + $0xa8] sm:$0xff]  ;;  %441 = vmatpush1.msra.mxu0 %v410_v3  ;;  %v405_v7 = vld [vmem:[%s1685_s12 + $0x98] sm:$0xff]  ;;  %v406_v8 = vld [vmem:[%s1685_s12 + $0xa0] sm:$0xff]  ;;  %s1109_s10 = smul.u32 384, %s1478_s21  ;;  %s903_s2 = scalar_lea.sflag [#allocation4], %s1674_s0 }
  0x6b   : > { %1137 = vmatpush3.msra.mxu1 %v412_v2  ;;  %442 = vmatprep.subr.mxu0 %v408_v4  ;;  %v404_v9 = vld [vmem:[%s1685_s12 + $0x90] sm:$0xff]  ;;  %v402_v10 = vld [vmem:[%s1685_s12 + $0x80] sm:$0xff]  ;;  %v403_v11 = vld [vmem:[%s1685_s12 + $0x88] sm:$0xff]  ;;  %s347_s24 = scalar_select %p346_p10, %s1478_s21, 1 }
  0x6c   : > { %1138 = vmatprep.subr.mxu1 %v409_v5  ;;  %443 = vmatpush1.msra.mxu0 %v407_v6  ;;  %v401_v12 = vld [vmem:[%s1685_s12 + $0x78] sm:$0xff]  ;;  %v399_v13 = vld [vmem:[%s1685_s12 + $0x68] sm:$0xff]  ;;  %v400_v14 = vld [vmem:[%s1685_s12 + $0x70] sm:$0xff]  ;;  %s1817_s26 = scalar_lea.vmem [#allocation10], %s1187_s15  ;;  %s1855_s16 = scalar_lea.hbm %s1939_s4, %s1109_s10 }
  0x6d   : > { %1139 = vmatpush3.msra.mxu1 %v409_v5  ;;  %444 = vmatprep.subr.mxu0 %v405_v7  ;;  %v398_v15 = vld [vmem:[%s1685_s12 + $0x60] sm:$0xff]  ;;  %v396_v16 = vld [vmem:[%s1685_s12 + $0x50] sm:$0xff]  ;;  %v397_v17 = vld [vmem:[%s1685_s12 + $0x58] sm:$0xff]  ;;  %s1188_s28 = smul.u32 80, %s347_s24  ;;  %s922_s27 = sshll.u32 %s1817_s26, 4  ;;  %s1857_s27 = int_to_ptr.vmem [resolvable:$true] %s922_s27 }
  0x6e   : > { %1140 = vmatprep.subr.mxu1 %v406_v8  ;;  %445 = vmatpush1.msra.mxu0 %v404_v9  ;;  %v395_v18 = vld [vmem:[%s1685_s12 + $0x48] sm:$0xff]  ;;  %v393_v19 = vld [vmem:[%s1685_s12 + $0x38] sm:$0xff]  ;;  %v394_v20 = vld [vmem:[%s1685_s12 + $0x40] sm:$0xff]  ;;  %s1394_s3 = scalar_lea.vmem %s1857_s27, 1536  ;;  %p1969_p3 = scmp.ne.s32.totalorder %s1953_s29, 0 }
  0x6f   : > { %1141 = vmatpush3.msra.mxu1 %v406_v8  ;;  %446 = vmatprep.subr.mxu0 %v402_v10  ;;  %v392_v21 = vld [vmem:[%s1685_s12 + $0x30] sm:$0xff]  ;;  %v390_v22 = vld [vmem:[%s1685_s12 + $0x20] sm:$0xff]  ;;  %v391_v23 = vld [vmem:[%s1685_s12 + $0x28] sm:$0xff]  ;;  %s1782_s14 = scalar_lea.vmem %s1940_s5, %s1188_s28  ;;  %p1395_p11 = scmp.ne.s32.totalorder %s1857_s27, %s1394_s3 }
  0x70   : > { %1142 = vmatprep.subr.mxu1 %v403_v11  ;;  %447 = vmatpush1.msra.mxu0 %v401_v12  ;;  %v389_v24 = vld [vmem:[%s1685_s12 + $0x18] sm:$0xff]  ;;  %v387_v25 = vld [vmem:[%s1685_s12 + $0x8] sm:$0xff]  ;;  %v388_v26 = vld [vmem:[%s1685_s12 + $0x10] sm:$0xff]  ;;  %861 = vst.msk [vmem:[%s1782_s14] sm:$0xff] %vm860_vm1, %v1497_v0  ;;  %s1498_s25 = smov [#allocation10]  }
  0x71   : > { %1143 = vmatpush3.msra.mxu1 %v403_v11  ;;  %448 = vmatprep.subr.mxu0 %v399_v13  ;;  %v386_v27 = vld [vmem:[%s1685_s12] sm:$0xff]  ;;  %v382_v28 = vld [vmem:[#allocation8] sm:$0xff]  ;;  %v378_v34 = vld [vmem:[%s1678_s9 + $0xb8] sm:$0xff]  ;;  %862 = vst.msk [vmem:[%s1782_s14 + $0x8] sm:$0xff] %vm860_vm1, %v1497_v0  ;;  %p1396_p9 = pnand %p1395_p11, %p1969_p3  ;;  %s1398_s20 = sshll.u32 %s1498_s25, 4  ;;  %s1399_s20 = int_to_ptr.vmem [resolvable:$false] %s1398_s20 }
  0x72   : > { %1144 = vmatprep.subr.mxu1 %v400_v14  ;;  %449 = vmatpush1.msra.mxu0 %v398_v15  ;;  %v380_v29 = vld [vmem:[%s1678_s9 + $0xc8] sm:$0xff]  ;;  %v381_v30 = vld [vmem:[%s1678_s9 + $0xd0] sm:$0xff]  ;;  %v379_v32 = vld [vmem:[%s1678_s9 + $0xc0] sm:$0xff]  ;;  %863 = vst.msk [vmem:[%s1782_s14 + $0x10] sm:$0xff] %vm860_vm1, %v1497_v0  ;;  %s1400_s21 = scalar_lea.vmem %s1399_s20, 3072  ;;  %p1401_p8 = scmp.lt.s32.totalorder %s1857_s27, %s1399_s20 }
  0x73   : > { %1145 = vmatpush3.msra.mxu1 %v400_v14  ;;  %450 = vmatprep.subr.mxu0 %v396_v16  ;;  %v383_v31 = vld [vmem:[#allocation8 + $0x8] sm:$0xff]  ;;  %v374_v36 = vld [vmem:[%s1678_s9 + $0x98] sm:$0xff]  ;;  %v375_v37 = vld [vmem:[%s1678_s9 + $0xa0] sm:$0xff]  ;;  %864 = vst.msk [vmem:[%s1782_s14 + $0x18] sm:$0xff] %vm860_vm1, %v1497_v0  ;;  %p1397_p7 = pneg %p1396_p9  ;;  %p1402_p4 = scmp.lt.s32.totalorder %s1400_s21, %s1394_s3 }
  0x74   : > { %1146 = vmatprep.subr.mxu1 %v397_v17  ;;  %451 = vmatpush1.msra.mxu0 %v395_v18  ;;  %v377_v33 = vld [vmem:[%s1678_s9 + $0xb0] sm:$0xff]  ;;  %v376_v35 = vld [vmem:[%s1678_s9 + $0xa8] sm:$0xff]  ;;  %v371_v39 = vld [vmem:[%s1678_s9 + $0x80] sm:$0xff]  ;;  %865 = vst.msk [vmem:[%s1782_s14 + $0x20] sm:$0xff] %vm860_vm1, %v1497_v0 }
  0x75   : > { %1147 = vmatpush3.msra.mxu1 %v397_v17  ;;  %452 = vmatprep.subr.mxu0 %v393_v19  ;;  %v373_v38 = vld [vmem:[%s1678_s9 + $0x90] sm:$0xff]  ;;  %v372_v40 = vld [vmem:[%s1678_s9 + $0x88] sm:$0xff]  ;;  %v370_v41 = vld [vmem:[%s1678_s9 + $0x78] sm:$0xff]  ;;  %866 = vst.msk [vmem:[%s1782_s14 + $0x28] sm:$0xff] %vm860_vm1, %v1497_v0  ;;  %p1403_p6 = por %p1402_p4, %p1401_p8 }
  0x76   : > { %1148 = vmatprep.subr.mxu1 %v394_v20  ;;  %453 = vmatpush1.msra.mxu0 %v392_v21  ;;  %v384_v42 = vld [vmem:[#allocation8 + $0x10] sm:$0xff]  ;;  %v368_v43 = vld [vmem:[%s1678_s9 + $0x68] sm:$0xff]  ;;  %v367_v45 = vld [vmem:[%s1678_s9 + $0x60] sm:$0xff]  ;;  %867 = vst.msk [vmem:[%s1782_s14 + $0x30] sm:$0xff] %vm860_vm1, %v1497_v0 }
  0x77   : > { %1149 = vmatpush3.msra.mxu1 %v394_v20  ;;  %454 = vmatprep.subr.mxu0 %v390_v22  ;;  %v369_v44 = vld [vmem:[%s1678_s9 + $0x70] sm:$0xff]  ;;  %v366_v47 = vld [vmem:[%s1678_s9 + $0x58] sm:$0xff]  ;;  %v364_v48 = vld [vmem:[%s1678_s9 + $0x48] sm:$0xff]  ;;  %868 = vst.msk [vmem:[%s1782_s14 + $0x38] sm:$0xff] %vm860_vm1, %v1497_v0  ;;  %p1404_p13 = pnand %p1403_p6, %p1397_p7 }
  0x78   : > { %1150 = vmatprep.subr.mxu1 %v391_v23  ;;  %455 = vmatpush1.msra.mxu0 %v389_v24  ;;  %v365_v46 = vld [vmem:[%s1678_s9 + $0x50] sm:$0xff]  ;;  %v385_v49 = vld [vmem:[#allocation8 + $0x18] sm:$0xff]  ;;  %v360_v54 = vld [vmem:[%s1678_s9 + $0x28] sm:$0xff]  ;;  %869 = vst.msk [vmem:[%s1782_s14 + $0x40] sm:$0xff] %vm860_vm1, %v1497_v0 }
  0x79   : > { %1151 = vmatpush3.msra.mxu1 %v391_v23  ;;  %456 = vmatprep.subr.mxu0 %v387_v25  ;;  %v362_v50 = vld [vmem:[%s1678_s9 + $0x38] sm:$0xff]  ;;  %v363_v51 = vld [vmem:[%s1678_s9 + $0x40] sm:$0xff]  ;;  %v361_v52 = vld [vmem:[%s1678_s9 + $0x30] sm:$0xff]  ;;  %870 = vst.msk [vmem:[%s1782_s14 + $0x48] sm:$0xff] %vm860_vm1, %v1497_v0 }
  0x7a   : > { %1152 = vmatprep.subr.mxu1 %v388_v26  ;;  %457 = vmatpush1.msra.mxu0 %v386_v27  ;;  %v359_v53 = vld [vmem:[%s1678_s9 + $0x20] sm:$0xff]  ;;  %v358_v55 = vld [vmem:[%s1678_s9 + $0x18] sm:$0xff]  ;;  %v356_v56 = vld [vmem:[%s1678_s9 + $0x8] sm:$0xff] }
  0x7b   : > { %1153 = vmatpush3.msra.mxu1 %v388_v26  ;;  %1088 = vmatmul.mubr.msk.f32.vlgmr.msra.gmra.mxu0 %vm413_vm0, %v382_v28  ;;  %v357_v57 = vld [vmem:[%s1678_s9 + $0x10] sm:$0xff]  ;;  %v355_v58 = vld [vmem:[%s1678_s9] sm:$0xff] }
  0x7c   : > { %1154 = vmatprep.mubr.msk.f32.mxu1 %vm413_vm0, %v382_v28  ;;  %626 = vmatprep.subr.mxu0 %v380_v29  ;;  %v351_v59 = vld [vmem:[#allocation7] sm:$0xff]  ;;  %v352_v60 = vld [vmem:[#allocation7 + $0x8] sm:$0xff]  ;;  %v353_v61 = vld [vmem:[#allocation7 + $0x10] sm:$0xff] }
  0x7d   : > { %1160 = vmatprep.subr.mxu1 %v381_v30  ;;  %1155 = vmatmul.mubr.msk.f32.vlgmr.msra.gmra.mxu1 %vm413_vm0, %v383_v31  ;;  %v354_v62 = vld [vmem:[#allocation7 + $0x18] sm:$0xff] }
  0x7e   : > { %627 = vmatpush1.msra.mxu0 %v379_v32  ;;  %1161 = vmatpush3.msra.mxu1 %v381_v30 }
  0x7f   : > { %628 = vmatprep.subr.mxu0 %v377_v33  ;;  %1162 = vmatprep.subr.mxu1 %v378_v34 }
  0x80   : > { %496 = vmatprep.mubr.f32.mxu0 %v1497_v0  ;;  %629 = vmatpush1.msra.mxu0 %v376_v35 }
  0x81   : > { %1163 = vmatpush3.msra.mxu1 %v378_v34  ;;  %1089 = vmatmul.mubr.msk.f32.gmra.mxu0 %vm413_vm0, %v383_v31 }
  0x82   : > { %630 = vmatprep.subr.mxu0 %v374_v36  ;;  %1164 = vmatprep.subr.mxu1 %v375_v37 }
  0x83   : > { %631 = vmatpush1.msra.mxu0 %v373_v38  ;;  %1165 = vmatpush3.msra.mxu1 %v375_v37 }
  0x84   : > { %632 = vmatprep.subr.mxu0 %v371_v39  ;;  %1166 = vmatprep.subr.mxu1 %v372_v40 }
  0x85   : > { %502 = vmatprep.mubr.f32.mxu0 %v1497_v0  ;;  %633 = vmatpush1.msra.mxu0 %v370_v41 }
  0x86   : > { %1167 = vmatpush3.msra.mxu1 %v372_v40  ;;  %1090 = vmatmul.mubr.msk.f32.gmra.mxu0 %vm413_vm0, %v384_v42 }
  0x87   : > { %634 = vmatprep.subr.mxu0 %v368_v43  ;;  %1168 = vmatprep.subr.mxu1 %v369_v44 }
  0x88   : > { %635 = vmatpush1.msra.mxu0 %v367_v45  ;;  %1169 = vmatpush3.msra.mxu1 %v369_v44 }
  0x89   : > { %636 = vmatprep.subr.mxu0 %v365_v46  ;;  %1170 = vmatprep.subr.mxu1 %v366_v47 }
  0x8a   : > { %508 = vmatprep.mubr.f32.mxu0 %v1497_v0  ;;  %637 = vmatpush1.msra.mxu0 %v364_v48 }
  0x8b   : > { %1171 = vmatpush3.msra.mxu1 %v366_v47  ;;  %1091 = vmatmul.mubr.msk.f32.gmra.mxu0 %vm413_vm0, %v385_v49 }
  0x8c   : > { %638 = vmatprep.subr.mxu0 %v362_v50  ;;  %1172 = vmatprep.subr.mxu1 %v363_v51 }
  0x8d   : > { %1157 = vmatprep.mubr.msk.f32.mxu1 %vm413_vm0, %v384_v42  ;;  %639 = vmatpush1.msra.mxu0 %v361_v52 }
  0x8e   : > { %1173 = vmatpush3.msra.mxu1 %v363_v51  ;;  %640 = vmatprep.subr.mxu0 %v359_v53 }
  0x8f   : > { %1158 = vmatmul.mubr.msk.f32.gmra.mxu1 %vm413_vm0, %v385_v49  ;;  %1174 = vmatprep.subr.mxu1 %v360_v54 }
  0x90   : > { %641 = vmatpush1.msra.mxu0 %v358_v55  ;;  %1175 = vmatpush3.msra.mxu1 %v360_v54 }
  0x91   : > { %642 = vmatprep.subr.mxu0 %v356_v56  ;;  %1176 = vmatprep.subr.mxu1 %v357_v57 }
  0x92   : > { %643 = vmatpush1.msra.mxu0 %v355_v58  ;;  %676 = vmatprep.mubr.f32.mxu0 %v1497_v0 }
  0x93   : > { %1177 = vmatpush3.msra.mxu1 %v357_v57  ;;  %1178 = vmatprep.mubr.msk.f32.mxu1 %vm413_vm0, %v351_v59 }
  0x94   : > { %1096 = vmatmul.mubr.msk.f32.vlgmr.msra.gmra.mxu0 %vm413_vm0, %v351_v59  ;;  %1179 = vmatmul.mubr.msk.f32.vlgmr.msra.gmra.mxu1 %vm413_vm0, %v352_v60 }
  0x95   : > { %682 = vmatprep.mubr.f32.mxu0 %v1497_v0  ;;  %1181 = vmatprep.mubr.msk.f32.mxu1 %vm413_vm0, %v353_v61 }
  0x98   : > { %1097 = vmatmul.mubr.msk.f32.gmra.mxu0 %vm413_vm0, %v352_v60  ;;  %1182 = vmatmul.mubr.msk.f32.gmra.mxu1 %vm413_vm0, %v354_v62 }
  0x99   : > { %688 = vmatprep.mubr.f32.mxu0 %v1497_v0 }
  0x9c   : > { %1098 = vmatmul.mubr.msk.f32.gmra.mxu0 %vm413_vm0, %v353_v61 }
  0x9d   : > { %694 = vmatprep.mubr.f32.mxu0 %v1497_v0 }
  0xa0   : > { %1099 = vmatmul.mubr.msk.f32.gmra.mxu0 %vm413_vm0, %v354_v62 }
 0x13b   : > { %v492_v63 = vpop.f32.mrf.mxu0 }
 0x13d   : > { %v494_v1 = vpop.f32.mrf.mxu0  ;;  %v1156_v5 = vpop.f32.mrf.mxu1 }
 0x13f   : > { %v581_v7 = vpop.f32.mrf.mxu1 }
 0x141   : > { %v498_v2 = vpop.f32.mrf.mxu0 }
 0x143   : > { %v500_v3 = vpop.f32.mrf.mxu0 }
 0x146   : > { %v504_v4 = vpop.f32.mrf.mxu0 }
 0x148   : > { %v506_v6 = vpop.f32.mrf.mxu0 }
 0x14b   : > { %v510_v8 = vpop.f32.mrf.mxu0 }
 0x14d   : > { %v512_v11 = vpop.f32.mrf.mxu0 }
 0x14f   : > { %v1159_v9 = vpop.f32.mrf.mxu1 }
 0x151   : > { %v591_v10 = vpop.f32.mrf.mxu1 }
 0x154   : > { %v678_v12 = vpop.f32.mrf.mxu0  ;;  %v1180_v14 = vpop.f32.mrf.mxu1 }
 0x155   : > { %v679_v13 = vadd.f32 %v678_v12, %v492_v63  ;;  %v1815_v15 = vadd.f32 %v1180_v14, %v1156_v5 }
 0x156   : > { %v680_v16 = vpop.f32.mrf.mxu0  ;;  %v767_v17 = vpop.f32.mrf.mxu1 }
 0x157   : > { %786 = vst [vmem:[%s1817_s26] sm:$0xff] %v679_v13  ;;  %v681_v0 = vadd.f32 %v680_v16, %v494_v1  ;;  %791 = vst [vmem:[%s1817_s26 + $0x28] sm:$0xff] %v1815_v15  ;;  %v768_v18 = vadd.f32 %v767_v17, %v581_v7  ;;  %v814_v23 = vmul.f32 %v679_v13, %v679_v13 }
 0x158   : > { %v684_v19 = vpop.f32.mrf.mxu0  ;;  %v1183_v21 = vpop.f32.mrf.mxu1  ;;  %v819_v38 = vmul.f32 %v1815_v15, %v1815_v15 }
 0x159   : > { %787 = vst [vmem:[%s1817_s26 + $0x8] sm:$0xff] %v681_v0  ;;  %v1823_v20 = vadd.f32 %v684_v19, %v498_v2  ;;  %v798_v22 = vadd.f32 %v681_v0, %v679_v13  ;;  %v815_v24 = vmul.f32 %v681_v0, %v681_v0  ;;  %788 = vst [vmem:[%s1817_s26 + $0x10] sm:$0xff] %v768_v18 }
 0x15a   : > { %v1826_v25 = vadd.f32 %v1183_v21, %v1159_v9  ;;  %v686_v26 = vpop.f32.mrf.mxu0  ;;  %v777_v28 = vpop.f32.mrf.mxu1  ;;  %v816_v34 = vmul.f32 %v768_v18, %v768_v18 }
 0x15b   : > { %789 = vst [vmem:[%s1817_s26 + $0x18] sm:$0xff] %v1823_v20  ;;  %v687_v27 = vadd.f32 %v686_v26, %v500_v3  ;;  %v799_v29 = vadd.f32 %v798_v22, %v768_v18  ;;  %v826_v30 = vadd.f32 %v815_v24, %v814_v23  ;;  %v778_v31 = vadd.f32 %v777_v28, %v591_v10 }
 0x15c   : > { %797 = vst [vmem:[%s1817_s26 + $0x58] sm:$0xff] %v1826_v25  ;;  %v690_v32 = vpop.f32.mrf.mxu0  ;;  %v817_v35 = vmul.f32 %v1823_v20, %v1823_v20 }
 0x15d   : > { %790 = vst [vmem:[%s1817_s26 + $0x20] sm:$0xff] %v687_v27  ;;  %v691_v33 = vadd.f32 %v690_v32, %v504_v4  ;;  %800 = vadd.xlane.f32.xlu0 %v799_v29  ;;  %v818_v36 = vmul.f32 %v687_v27, %v687_v27  ;;  %794 = vst [vmem:[%s1817_s26 + $0x40] sm:$0xff] %v778_v31  ;;  %v827_v40 = vadd.f32 %v826_v30, %v816_v34 }
 0x15e   : > { %v692_v37 = vpop.f32.mrf.mxu0  ;;  %v802_v42 = vadd.f32 %v687_v27, %v1823_v20  ;;  %v822_v54 = vmul.f32 %v778_v31, %v778_v31  ;;  %v844_v63 = vmul.f32 %v778_v31, %v768_v18  ;;  %v825_v4 = vmul.f32 %v1826_v25, %v1826_v25 }
 0x15f   : > { %792 = vst [vmem:[%s1817_s26 + $0x30] sm:$0xff] %v691_v33  ;;  %v693_v39 = vadd.f32 %v692_v37, %v506_v6  ;;  %v830_v41 = vadd.f32 %v818_v36, %v817_v35  ;;  %v820_v44 = vmul.f32 %v691_v33, %v691_v33  ;;  %v842_v57 = vmul.f32 %v691_v33, %v679_v13 }
 0x160   : > { %v696_v43 = vpop.f32.mrf.mxu0  ;;  %v803_v51 = vadd.f32 %v802_v42, %v1815_v15 }
 0x161   : > { %793 = vst [vmem:[%s1817_s26 + $0x38] sm:$0xff] %v693_v39  ;;  %v697_v45 = vadd.f32 %v696_v43, %v510_v8  ;;  %828 = vadd.xlane.f32.xlu0 %v827_v40  ;;  %v831_v46 = vadd.f32 %v830_v41, %v819_v38  ;;  %v806_v47 = vadd.f32 %v693_v39, %v691_v33 }
 0x162   : > { %v821_v48 = vmul.f32 %v693_v39, %v693_v39  ;;  %v698_v49 = vpop.f32.mrf.mxu0  ;;  %v843_v53 = vmul.f32 %v693_v39, %v681_v0  ;;  %v847_v8 = vmul.f32 %v1826_v25, %v1815_v15 }
 0x163   : > { %795 = vst [vmem:[%s1817_s26 + $0x48] sm:$0xff] %v697_v45  ;;  %v699_v50 = vadd.f32 %v698_v49, %v512_v11  ;;  %832 = vadd.xlane.f32.xlu1 %v831_v46  ;;  %v807_v55 = vadd.f32 %v806_v47, %v778_v31  ;;  %v823_v61 = vmul.f32 %v697_v45, %v697_v45 }
 0x164   : > { %v834_v52 = vadd.f32 %v821_v48, %v820_v44  ;;  %v848_v60 = vadd.f32 %v843_v53, %v842_v57  ;;  %v845_v5 = vmul.f32 %v697_v45, %v1823_v20 }
 0x165   : > { %796 = vst [vmem:[%s1817_s26 + $0x50] sm:$0xff] %v699_v50  ;;  %804 = vadd.xlane.f32.xlu0 %v803_v51  ;;  %v810_v56 = vadd.f32 %v699_v50, %v697_v45  ;;  %v824_v58 = vmul.f32 %v699_v50, %v699_v50  ;;  %v846_v2 = vmul.f32 %v699_v50, %v687_v27 }
 0x166   : > { %v835_v59 = vadd.f32 %v834_v52, %v822_v54  ;;  %v849_v3 = vadd.f32 %v848_v60, %v844_v63 }
 0x167   : > { %808 = vadd.xlane.f32.xlu1 %v807_v55  ;;  %v811_v62 = vadd.f32 %v810_v56, %v1826_v25  ;;  %v838_v1 = vadd.f32 %v824_v58, %v823_v61  ;;  %v852_v7 = vadd.f32 %v846_v2, %v845_v5 }
 0x169   : > { %836 = vadd.xlane.f32.xlu0 %v835_v59  ;;  %v839_v6 = vadd.f32 %v838_v1, %v825_v4  ;;  %v853_v9 = vadd.f32 %v852_v7, %v847_v8 }
 0x16b   : > { %812 = vadd.xlane.f32.xlu1 %v811_v62 }
 0x16d   : > { %850 = vadd.xlane.f32.xlu0 %v849_v3 }
 0x16f   : > { %840 = vadd.xlane.f32.xlu1 %v839_v6 }
 0x173   : > { %854 = vadd.xlane.f32.xlu1 %v853_v9 }
 0x174   : > { %1407 = shalt.err (!%p1404_p13)
}
 0x175   : > { %s1408_s13 = scalar_lea.hbm %s1855_s16, 1536  ;;  %s1412_s6 = scalar_lea.hbm %s1939_s4, 3072 }
 0x176   : > { %p1409_p0 = scmp.ne.s32.totalorder %s1855_s16, %s1408_s13  ;;  %p1413_p5 = scmp.lt.s32.totalorder %s1855_s16, %s1939_s4 }
 0x177   : > { %p1414_p1 = scmp.lt.s32.totalorder %s1412_s6, %s1408_s13 }
 0x178   : > { %p1410_p12 = pnand %p1409_p0, %p1969_p3 }
 0x179   : > { %p1415_p10 = por %p1414_p1, %p1413_p5 }
 0x17a   : > { %p1411_p2 = pneg %p1410_p12 }
 0x17c   : > { %p1416_p11 = pnand %p1415_p10, %p1411_p2 }
 0x17e   : > { %1419 = shalt.err (!%p1416_p11)
}
 0x17f   : > { %s1499_s28 = smov 384   ;;  %s1500_s8 = smov 768   ;;  %v871_v10 = vld [vmem:[%s1782_s14] sm:$0xff]  ;;  %v876_v15 = vld [vmem:[%s1782_s14 + $0x28] sm:$0xff]  ;;  %v873_v20 = vld [vmem:[%s1782_s14 + $0x10] sm:$0xff] }
 0x180   : > { %s1501_s11 = smov 24   ;;  %v875_v13 = vld [vmem:[%s1782_s14 + $0x20] sm:$0xff]  ;;  %v872_v17 = vld [vmem:[%s1782_s14 + $0x8] sm:$0xff]  ;;  %v877_v23 = vld [vmem:[%s1782_s14 + $0x30] sm:$0xff] }
 0x181   : > { %1201 = dma.vmem_to_hbm [thread:$0]  (%p1969_p3), %s1857_s27, 1536, %s1855_s16, %s903_s2, %s1499_s28, %s1500_s8, %s1501_s11  }
 0x182   : > { %v874_v26 = vld [vmem:[%s1782_s14 + $0x18] sm:$0xff]  ;;  %v879_v29 = vld [vmem:[%s1782_s14 + $0x40] sm:$0xff]  ;;  %v880_v36 = vld [vmem:[%s1782_s14 + $0x48] sm:$0xff] }
 0x183   : > { %v878_v32 = vld [vmem:[%s1782_s14 + $0x38] sm:$0xff] }
 0x1e6   : > { %v801_v11 = vpop.xlane.xlu0 %800 }
 0x1e7   : > { %v881_v12 = vadd.f32 %v871_v10, %v801_v11 }
 0x1e9   : > { %892 = vst.msk [vmem:[%s1782_s14] sm:$0xff] %vm860_vm1, %v881_v12 }
 0x1ea   : > { %v829_v14 = vpop.xlane.xlu0 %828 }
 0x1eb   : > { %v885_v16 = vadd.f32 %v875_v13, %v829_v14 }
 0x1ec   : > { %v833_v0 = vpop.xlane.xlu1 %832 }
 0x1ed   : > { %896 = vst.msk [vmem:[%s1782_s14 + $0x20] sm:$0xff] %vm860_vm1, %v885_v16  ;;  %v886_v18 = vadd.f32 %v876_v15, %v833_v0 }
 0x1ee   : > { %v805_v19 = vpop.xlane.xlu0 %804 }
 0x1ef   : > { %897 = vst.msk [vmem:[%s1782_s14 + $0x28] sm:$0xff] %vm860_vm1, %v886_v18  ;;  %v882_v21 = vadd.f32 %v872_v17, %v805_v19 }
 0x1f0   : > { %v809_v22 = vpop.xlane.xlu1 %808 }
 0x1f1   : > { %893 = vst.msk [vmem:[%s1782_s14 + $0x8] sm:$0xff] %vm860_vm1, %v882_v21  ;;  %v883_v24 = vadd.f32 %v873_v20, %v809_v22 }
 0x1f2   : > { %v837_v25 = vpop.xlane.xlu0 %836 }
 0x1f3   : > { %894 = vst.msk [vmem:[%s1782_s14 + $0x10] sm:$0xff] %vm860_vm1, %v883_v24  ;;  %v887_v27 = vadd.f32 %v877_v23, %v837_v25 }
 0x1f4   : > { %v813_v28 = vpop.xlane.xlu1 %812 }
 0x1f5   : > { %898 = vst.msk [vmem:[%s1782_s14 + $0x30] sm:$0xff] %vm860_vm1, %v887_v27  ;;  %v884_v30 = vadd.f32 %v874_v26, %v813_v28 }
 0x1f6   : > { %v851_v31 = vpop.xlane.xlu0 %850 }
 0x1f7   : > { %895 = vst.msk [vmem:[%s1782_s14 + $0x18] sm:$0xff] %vm860_vm1, %v884_v30  ;;  %v889_v33 = vadd.f32 %v879_v29, %v851_v31 }
 0x1f8   : > { %v841_v34 = vpop.xlane.xlu1 %840 }
 0x1f9   : > { %900 = vst.msk [vmem:[%s1782_s14 + $0x40] sm:$0xff] %vm860_vm1, %v889_v33  ;;  %v888_v35 = vadd.f32 %v878_v32, %v841_v34 }
 0x1fb   : > { %899 = vst.msk [vmem:[%s1782_s14 + $0x38] sm:$0xff] %vm860_vm1, %v888_v35 }
 0x1fc   : > { %v855_v37 = vpop.xlane.xlu1 %854 }
 0x1fd   : > { %v890_v38 = vadd.f32 %v880_v36, %v855_v37 }
 0x1ff   : > { %901 = vst.msk [vmem:[%s1782_s14 + $0x48] sm:$0xff] %vm860_vm1, %v890_v38 }
 0x200 PF: > { %s1970_s29 = sld [smem:[#allocation17_spill]]  ;;  %s940_s0 = sand.u32 1, %s1466_s18  }
 0x201   : > { %p1972_p9 = scmp.ge.s32.totalorder %s1486_s23, 2  ;;  %s941_s15 = scalar_lea.sflag [#allocation4], %s940_s0 }
 0x206   : > { %p1971_p3 = scmp.ne.s32.totalorder %s1970_s29, 0 }
 0x208   : > { %p1218_p7 = pnand %p1972_p9, %p1971_p3 }
 0x20a   : > { %p1219_p8 = pneg %p1218_p7 }
 0x20c   : > { %1461 = dma.done.wait (%p1219_p8), %s941_s15, 1536  }
 0x20d   : > { %1463 = vsyncadd (%p1219_p8), %s941_s15, 4294965760  ;;  %s26_s23 = sadd.s32 1, %s1486_s23   ;;  %s1973_s26 = sld [smem:[#allocation16_spill]] }
 0x20e   : > { %p23_p4 = scmp.ge.s32.totalorder %s26_s23, 4   ;;  %s1974_s20 = sld [smem:[#allocation19_spill]] }
 0x20f   : > { %s1975_s14 = sld [smem:[#allocation18_spill]]  ;;  %s1976_s18 = smov %s1470_s19 }
 0x210   : > { %s1978_s21 = smov %s1482_s22 }
 0x211   :  { %25 = sbr.rel (!%p23_p4) target bundleno = 13 (0xd), region = 118 }
 0x213   : > { %s1977_s19 = smov %s1973_s26 }
 0x215   : > { %s1979_s22 = smov %s1975_s14 }
 0x216   :  { %954 = vsyncpa [#allocation3], 1 }
 0x217   :  { %956 = vsyncpa [#allocation3 + $0x1], 1 }
 0x218   :  { %957 = vsyncpa [#allocation6], 1 }
 0x219   :  { %959 = vsyncpa [#allocation6 + $0x1], 1 }
 0x21a   :  { %960 = vsyncpa [#allocation9], 1 }
 0x21b   :  { %961 = vsyncpa [#allocation4], 1 }
 0x21c   :  { %963 = vsyncpa [#allocation4 + $0x1], 1 }

</bundles_post_ra>
